<compile_context>
chip_gen: v7x
topology: tpu7x:2x2x1
jax: 0.10.0
libtpu: 0.0.40
codegen_flags: <defaults>
</compile_context>

<pallas_src>
import functools

import jax
import jax.numpy as jnp
from jax.experimental import pallas as pl
from jax.experimental.pallas import tpu as pltpu


def _cross_cond_kernel(audio_ref, text_ref, w_ref, out_audio_ref, out_text_ref, *, dim):
    """One row tile; both conditioning projections fused into a single wide matmul pair."""
    a = audio_ref[...]                      # (TM, D)
    t = text_ref[...]                       # (TM, DT)
    # concat([a, t]) @ W_cat  ==  a @ W_cat[:D] + t @ W_cat[D:]
    # W_cat columns = [text_cond (D) | audio_cond (DT)].
    cond = jnp.dot(a, w_ref[:dim, :], preferred_element_type=jnp.float32)
    cond = cond + jnp.dot(t, w_ref[dim:, :], preferred_element_type=jnp.float32)
    out_audio_ref[...] = (a.astype(jnp.float32) + cond[:, :dim]).astype(out_audio_ref.dtype)
    out_text_ref[...] = (t.astype(jnp.float32) + cond[:, dim:]).astype(out_text_ref.dtype)


def _text_to_audio_kernel(audio_ref, text_ref, w_ref, out_audio_ref, *, dim):
    """cond_audio_to_text=False variant: only text_cond is computed (text passes through outside)."""
    a = audio_ref[...]                      # (TM, D)
    t = text_ref[...]                       # (TM, DT)
    cond = jnp.dot(a, w_ref[:dim, :], preferred_element_type=jnp.float32)
    cond = cond + jnp.dot(t, w_ref[dim:, :], preferred_element_type=jnp.float32)
    out_audio_ref[...] = (a.astype(jnp.float32) + cond).astype(out_audio_ref.dtype)


def prepare_cross_cond_weights(w_text_to_audio, w_audio_to_text=None):
    """One-time weight transform -- keep this OUT of the per-step call path.

    PyTorch Linear weights are (out, in) with in = [audio | text].  Transpose to (in, out) and,
    when both projections exist, fuse them column-wise into a single (D+DT, D+DT) matrix whose
    columns are [text_cond (D) | audio_cond (DT)].
    """
    w_t2a = jnp.asarray(w_text_to_audio).T              # (D+DT, D)
    if w_audio_to_text is None:
        return w_t2a
    w_a2t = jnp.asarray(w_audio_to_text).T              # (D+DT, DT)
    return jnp.concatenate([w_t2a, w_a2t], axis=-1)     # (D+DT, D+DT)


def text_audio_cross_condition(audio, text, w_fused, *, cond_audio_to_text=True, row_tile=256):
    """
    audio:   (B, N, D)
    text:    (B, N, DT)
    w_fused: output of prepare_cross_cond_weights():
             (D+DT, D+DT) if cond_audio_to_text else (D+DT, D)
    """
    B, N, D = audio.shape
    DT = text.shape[-1]
    DIN = D + DT
    rows = B * N

    # Flatten (B, N, .) -> (B*N, .): free row-major reshape; gives a 1-D grid of independent
    # row tiles (pipelining granularity + megacore / 2-TC sharding).
    a2 = audio.reshape(rows, D)
    t2 = text.reshape(rows, DT)

    # Largest row tile that keeps double-buffered activations + resident weights comfortably
    # inside the 32 MiB scoped-VMEM default (valid on v5e/v6e and on v7x's 64 MiB VMEM).
    # row_tile must be a multiple of 8; if the whole problem is smaller, use one full block.
    tm = rows if rows <= row_tile else row_tile
    grid = (pl.cdiv(rows, tm),)

    act_in_specs = [
        pl.BlockSpec((tm, D), lambda i: (i, 0)),
        pl.BlockSpec((tm, DT), lambda i: (i, 0)),
    ]
    cparams = pltpu.CompilerParams(dimension_semantics=("parallel",))

    if cond_audio_to_text:
        assert w_fused.shape == (DIN, DIN)
        kernel = functools.partial(_cross_cond_kernel, dim=D)
        out_a, out_t = pl.pallas_call(
            kernel,
            out_shape=(
                jax.ShapeDtypeStruct((rows, D), audio.dtype),
                jax.ShapeDtypeStruct((rows, DT), text.dtype),
            ),
            grid_spec=pltpu.PrefetchScalarGridSpec(
                num_scalar_prefetch=0,
                grid=grid,
                in_specs=act_in_specs
                + [pl.BlockSpec((DIN, DIN), lambda i: (0, 0))],   # resident fused weight
                out_specs=[
                    pl.BlockSpec((tm, D), lambda i: (i, 0)),
                    pl.BlockSpec((tm, DT), lambda i: (i, 0)),
                ],
            ),
            compiler_params=cparams,
        )(a2, t2, w_fused)
        return out_a.reshape(B, N, D), out_t.reshape(B, N, DT)

    # cond_audio_to_text=False: no zero-weight DMA, no zero matmuls, text passes through.
    assert w_fused.shape == (DIN, D)
    kernel = functools.partial(_text_to_audio_kernel, dim=D)
    out_a = pl.pallas_call(
        kernel,
        out_shape=jax.ShapeDtypeStruct((rows, D), audio.dtype),
        grid_spec=pltpu.PrefetchScalarGridSpec(
            num_scalar_prefetch=0,
            grid=grid,
            in_specs=act_in_specs + [pl.BlockSpec((DIN, D), lambda i: (0, 0))],
            out_specs=pl.BlockSpec((tm, D), lambda i: (i, 0)),
        ),
        compiler_params=cparams,
    )(a2, t2, w_fused)
    return out_a.reshape(B, N, D), text


def _reference(audio, text, w_t2a, w_a2t, cond_audio_to_text=True):
    audio_text = jnp.concatenate([audio, text], axis=-1)
    text_cond = audio_text @ w_t2a.T
    audio_cond = audio_text @ w_a2t.T if cond_audio_to_text else 0.0
    return audio + text_cond, text + audio_cond


if __name__ == "__main__":
    key = jax.random.PRNGKey(0)
    k_a, k_t, k_w1, k_w2 = jax.random.split(key, 4)

    B, N, D, DT = 2, 16, 32, 16

    audio = jax.random.normal(k_a, (B, N, D), dtype=jnp.float32)
    text = jax.random.normal(k_t, (B, N, DT), dtype=jnp.float32)

    # PyTorch Linear weight shapes: text_to_audio (D, D+DT), audio_to_text (DT, D+DT).
    w_text_to_audio = 0.02 * jax.random.normal(k_w1, (D, D + DT), dtype=jnp.float32)
    w_audio_to_text = 0.02 * jax.random.normal(k_w2, (DT, D + DT), dtype=jnp.float32)

    # One-time weight fusion (kept out of the per-call hot path).
    w_fused = prepare_cross_cond_weights(w_text_to_audio, w_audio_to_text)
    w_t2a_only = prepare_cross_cond_weights(w_text_to_audio)

    # 1) default: whole (B*N) fits one block.
    out_audio, out_text = text_audio_cross_condition(audio, text, w_fused)
    # 2) force a multi-step row-tiled grid (exercises the pipelined path).
    out_audio_t, out_text_t = text_audio_cross_condition(audio, text, w_fused, row_tile=8)
    # 3) cond_audio_to_text=False path.
    out_audio_nc, out_text_nc = text_audio_cross_condition(
        audio, text, w_t2a_only, cond_audio_to_text=False)

    jax.block_until_ready((out_audio, out_text, out_audio_t, out_text_t,
                           out_audio_nc, out_text_nc))

    ref_audio, ref_text = _reference(audio, text, w_text_to_audio, w_audio_to_text)
    ref_audio_nc, _ = _reference(audio, text, w_text_to_audio, w_audio_to_text,
                                 cond_audio_to_text=False)

    assert jnp.allclose(out_audio, ref_audio, atol=1e-5, rtol=1e-5)
    assert jnp.allclose(out_text, ref_text, atol=1e-5, rtol=1e-5)
    assert jnp.allclose(out_audio_t, ref_audio, atol=1e-5, rtol=1e-5)
    assert jnp.allclose(out_text_t, ref_text, atol=1e-5, rtol=1e-5)
    assert jnp.allclose(out_audio_nc, ref_audio_nc, atol=1e-5, rtol=1e-5)
    assert jnp.allclose(out_text_nc, text, atol=1e-5, rtol=1e-5)

    print("KERNEL_OK")
</pallas_src>

<mosaic_0001>
module attributes {stable_mosaic.version = 11 : i64} {
  func.func @_cross_cond_kernel(%arg0: i32, %arg1: memref<32x32xf32, #tpu.memory_space<vmem>>, %arg2: memref<32x16xf32, #tpu.memory_space<vmem>>, %arg3: memref<48x48xf32, #tpu.memory_space<vmem>>, %arg4: memref<32x32xf32, #tpu.memory_space<vmem>>, %arg5: memref<32x16xf32, #tpu.memory_space<vmem>>) attributes {dimension_semantics = [#tpu.dimension_semantics<parallel>], iteration_bounds = array<i64: 1>, scalar_prefetch = 0 : i64, scratch_operands = 0 : i64, tpu.core_type = #tpu.core_type<tc>, window_params = [{transform_indices = @transform_0, window_bounds = array<i64: 32, 32>}, {transform_indices = @transform_1, window_bounds = array<i64: 32, 16>}, {pipeline_mode = #tpu.pipeline_mode<synchronous>, transform_indices = @transform_2, window_bounds = array<i64: 48, 48>}, {transform_indices = @transform_3, window_bounds = array<i64: 32, 32>}, {transform_indices = @transform_4, window_bounds = array<i64: 32, 16>}]} {
    %c0 = arith.constant 0 : index
    %c0_0 = arith.constant 0 : index
    %0 = vector.load %arg1[%c0, %c0_0] : memref<32x32xf32, #tpu.memory_space<vmem>>, vector<32x32xf32>
    %c0_1 = arith.constant 0 : index
    %c0_2 = arith.constant 0 : index
    %1 = vector.load %arg2[%c0_1, %c0_2] : memref<32x16xf32, #tpu.memory_space<vmem>>, vector<32x16xf32>
    %c0_3 = arith.constant 0 : index
    %c0_4 = arith.constant 0 : index
    %2 = vector.load %arg3[%c0_3, %c0_4] : memref<48x48xf32, #tpu.memory_space<vmem>>, vector<32x48xf32>
    %cst = arith.constant dense<0.000000e+00> : vector<32x48xf32>
    %3 = tpu.matmul %0, %2, %cst {dimension_numbers = #tpu.dot_dimension_numbers<[1], [0], [0], [1], [0, 0, 1, 1], [], []>} : vector<32x32xf32>, vector<32x48xf32>, vector<32x48xf32> -> vector<32x48xf32>
    %c32 = arith.constant 32 : index
    %c0_5 = arith.constant 0 : index
    %4 = vector.load %arg3[%c32, %c0_5] : memref<48x48xf32, #tpu.memory_space<vmem>>, vector<16x48xf32>
    %cst_6 = arith.constant dense<0.000000e+00> : vector<32x48xf32>
    %5 = tpu.matmul %1, %4, %cst_6 {dimension_numbers = #tpu.dot_dimension_numbers<[1], [0], [0], [1], [0, 0, 1, 1], [], []>} : vector<32x16xf32>, vector<16x48xf32>, vector<32x48xf32> -> vector<32x48xf32>
    %6 = arith.addf %3, %5 : vector<32x48xf32>
    %7 = vector.extract_strided_slice %6 {offsets = [0, 0], sizes = [32, 32], strides = [1, 1]} : vector<32x48xf32> to vector<32x32xf32>
    %8 = arith.addf %0, %7 : vector<32x32xf32>
    %c0_7 = arith.constant 0 : index
    %c0_8 = arith.constant 0 : index
    %9 = vector.load %arg4[%c0_7, %c0_8] : memref<32x32xf32, #tpu.memory_space<vmem>>, vector<32x32xf32>
    tpu.vector_store %arg4[%c0_7, %c0_8], %8 {strides = array<i32>} : memref<32x32xf32, #tpu.memory_space<vmem>>, vector<32x32xf32>,
    %10 = vector.extract_strided_slice %6 {offsets = [0, 32], sizes = [32, 16], strides = [1, 1]} : vector<32x48xf32> to vector<32x16xf32>
    %11 = arith.addf %1, %10 : vector<32x16xf32>
    %c0_9 = arith.constant 0 : index
    %c0_10 = arith.constant 0 : index
    %12 = vector.load %arg5[%c0_9, %c0_10] : memref<32x16xf32, #tpu.memory_space<vmem>>, vector<32x16xf32>
    tpu.vector_store %arg5[%c0_9, %c0_10], %11 {strides = array<i32>} : memref<32x16xf32, #tpu.memory_space<vmem>>, vector<32x16xf32>,
    return
  }
  func.func @transform_0(%arg0: i32) -> (i32, i32) {
    %c0_i32 = arith.constant 0 : i32
    %c0_i32_0 = arith.constant 0 : i32
    return %arg0, %c0_i32 : i32, i32
  }
  func.func @transform_1(%arg0: i32) -> (i32, i32) {
    %c0_i32 = arith.constant 0 : i32
    %c0_i32_0 = arith.constant 0 : i32
    return %arg0, %c0_i32 : i32, i32
  }
  func.func @transform_2(%arg0: i32) -> (i32, i32) {
    %c0_i32 = arith.constant 0 : i32
    %c0_i32_0 = arith.constant 0 : i32
    %c0_i32_1 = arith.constant 0 : i32
    return %c0_i32, %c0_i32_0 : i32, i32
  }
  func.func @transform_3(%arg0: i32) -> (i32, i32) {
    %c0_i32 = arith.constant 0 : i32
    %c0_i32_0 = arith.constant 0 : i32
    return %arg0, %c0_i32 : i32, i32
  }
  func.func @transform_4(%arg0: i32) -> (i32, i32) {
    %c0_i32 = arith.constant 0 : i32
    %c0_i32_0 = arith.constant 0 : i32
    return %arg0, %c0_i32 : i32, i32
  }
}

</mosaic_0001>

<bundles_post_ra>
// kernel: tpu_custom_call.1
= control target key start
LH: loop header
LB: loop body
LE: loop exit
PB: predicated region body
PF: predicated region fallthrough
CT: control target
= control target key end

     0   :  { %10 = vsyncpa [#allocation3], 0  ;;  %s535_s0 = inlined_call_operand.hbm [shape: f32[32,32], index: 0, kind: input, shape index: {}]   ;;  %s536_s1 = inlined_call_operand.vmem [shape: f32[32,16], index: 1, kind: input, shape index: {}]   ;;  %s537_s2 = inlined_call_operand.vmem [shape: f32[48,48], index: 2, kind: input, shape index: {}]   ;;  %s538_s3 = inlined_call_operand.hbm [shape: f32[32,32], index: 3, kind: output, shape index: {0}]   ;;  %s539_s4 = inlined_call_operand.vmem [shape: f32[32,16], index: 4, kind: output, shape index: {1}]  }
   0x1   :  { %11 = vsyncpa [#allocation4], 0  ;;  %s409_s15 = smov [#allocation2]   ;;  %s361_s19 = scalar_lea.hbm %s535_s0, 512 }
   0x2   :  { %s17_s16 = sshll.u32 %s409_s15, 4  ;;  %p362_p0 = scmp.ne.s32.totalorder %s535_s0, %s361_s19  ;;  %s18_s16 = int_to_ptr.vmem [resolvable:$true] %s17_s16 }
   0x3   :  { %p365_p1 = scmp.lt.u32.totalorder %s361_s19, %s535_s0 }
   0x5   :  { %p367_p2 = pnand %p365_p1, %p362_p0 }
   0x7   :  { %370 = shalt.err (!%p367_p2)
}
   0x8   :  { %s371_s24 = scalar_lea.vmem %s18_s16, 512  ;;  %p376_p4 = scmp.lt.s32.totalorder %s18_s16, %s18_s16 }
   0x9   :  { %p372_p3 = scmp.ne.s32.totalorder %s18_s16, %s371_s24  ;;  %p377_p5 = scmp.lt.s32.totalorder %s371_s24, %s371_s24 }
   0xb   :  { %p378_p6 = por %p377_p5, %p376_p4 }
   0xd   :  { %p379_p7 = pnand %p378_p6, %p372_p3 }
   0xf   :  { %382 = shalt.err (!%p379_p7)
}
  0x10   :  { %s410_s25 = smov 128   ;;  %s411_s26 = smov 8  }
  0x11   :  { %23 = dma.hbm_to_vmem [thread:$0]  %s535_s0, 512, %s18_s16, [#allocation3], %s410_s25, %s410_s25, %s411_s26  }
  0x12   :  { %405 = dma.done.wait [#allocation3], 512  }
  0x13   :  { %406 = vsyncadd [#allocation3], 4294966784  ;;  %v39_v0 = vld [vmem:[%s537_s2] sm:$0xff]  ;;  %v40_v1 = vld [vmem:[%s537_s2 + $0x8] sm:$0xff]  ;;  %vm45_vm0 = vcmask 130048   ;;  %vm143_vm1 = vcmask 261120  }
  0x14   :  { %v43_v2 = vld [vmem:[%s537_s2 + $0x20] sm:$0xff]  ;;  %v344_v3 = vpack.c.bf16 %v40_v1, %v39_v0  ;;  %v44_v4 = vld [vmem:[%s537_s2 + $0x28] sm:$0xff]  ;;  %v41_v5 = vld [vmem:[%s537_s2 + $0x10] sm:$0xff]  ;;  %s413_s21 = smov [#allocation5]  }
  0x15   :  { %v42_v6 = vld [vmem:[%s537_s2 + $0x18] sm:$0xff]  ;;  %v340_v7 = vpack.c.bf16 %v44_v4, %v43_v2  ;;  %v475_v9 = vld [vmem:[%s536_s1] sm:$0xff]  ;;  %v36_v11 = vld [vmem:[%s536_s1 + $0x8] sm:$0xff]  ;;  %s278_s22 = sshll.u32 %s413_s21, 4  ;;  %s279_s22 = int_to_ptr.vmem [resolvable:$true] %s278_s22 }
  0x16   :  { %v348_v8 = vpack.c.bf16 %v42_v6, %v41_v5  ;;  %345 = vmatprep.subr.bf16.mxu0 %v344_v3  ;;  %320 = vmatprep.mubr.msk.f32.mxu1 %vm45_vm0, %v475_v9  ;;  %v31_v10 = vld [vmem:[#allocation2] sm:$0xff]  ;;  %v37_v12 = vld [vmem:[%s536_s1 + $0x10] sm:$0xff]  ;;  %v32_v13 = vld [vmem:[#allocation2 + $0x8] sm:$0xff]  ;;  %s383_s23 = scalar_lea.vmem %s279_s22, 512  ;;  %p388_p9 = scmp.lt.s32.totalorder %s279_s22, %s279_s22 }
  0x17   :  { %347 = vmatpush3.bf16.msra.mxu0 %v344_v3  ;;  %341 = vmatprep.subr.bf16.mxu1 %v340_v7  ;;  %v38_v14 = vld [vmem:[%s536_s1 + $0x18] sm:$0xff]  ;;  %v33_v15 = vld [vmem:[#allocation2 + $0x10] sm:$0xff]  ;;  %s412_s1 = smov 96   ;;  %p384_p8 = scmp.ne.s32.totalorder %s279_s22, %s383_s23 }
  0x18   :  { %343 = vmatpush3.bf16.msra.mxu1 %v340_v7  ;;  %349 = vmatprep.subr.bf16.mxu0 %v348_v8  ;;  %v34_v16 = vld [vmem:[#allocation2 + $0x18] sm:$0xff]  ;;  %p389_p10 = scmp.lt.s32.totalorder %s383_s23, %s383_s23 }
  0x19   :  { %334 = vmatprep.mubr.msk.f32.mxu0 %vm143_vm1, %v31_v10 }
  0x1a   :  { %p390_p11 = por %p389_p10, %p388_p9 }
  0x1b   :  { %351 = vmatpush3.bf16.msra.mxu0 %v348_v8  ;;  %321 = vmatmul.mubr.msk.f32.vlgmr.msra.gmra.mrb[0].mxu1 %vm45_vm0, %v36_v11 }
  0x1c   :  { %323 = vmatprep.mubr.msk.f32.mxu1 %vm45_vm0, %v37_v12  ;;  %p391_p12 = pnand %p390_p11, %p384_p8 }
  0x1e   :  { %335 = vmatmul.mubr.msk.f32.vlgmr.msra.gmra.mrb[0].mxu0 %vm143_vm1, %v32_v13 }
  0x1f   :  { %324 = vmatmul.mubr.msk.f32.gmra.mrb[2].mxu1 %vm45_vm0, %v38_v14  ;;  %337 = vmatprep.mubr.msk.f32.mxu0 %vm143_vm1, %v33_v15 }
  0x22   :  { %338 = vmatmul.mubr.msk.f32.gmra.mrb[2].mxu0 %vm143_vm1, %v34_v16 }
  0xee   :  { %v322_v17 = vpop.f32.mrb[0].mxu1 }
  0xef   :  { %v124_v18 = vpop.f32.mrb[1].mxu1 }
  0xf1   :  { %v336_v19 = vpop.f32.mrb[0].mxu0 }
  0xf2   :  { %v228_v20 = vadd.f32 %v336_v19, %v322_v17  ;;  %v222_v21 = vpop.f32.mrb[1].mxu0  ;;  %v325_v22 = vpop.f32.mrb[2].mxu1 }
  0xf3   :  { %v223_v23 = vadd.f32 %v222_v21, %v124_v18  ;;  %v134_v24 = vpop.f32.mrb[3].mxu1 }
  0xf4   :  { %v242_v25 = vadd.f32 %v228_v20, %v32_v13 }
  0xf5   :  { %v241_v26 = vadd.f32 %v223_v23, %v31_v10  ;;  %v339_v27 = vpop.f32.mrb[2].mxu0  ;;  %253 = vrot.lane.b32.xlu0 %v223_v23, %s412_s1 }
  0xf6   :  { %246 = vst.msk [vmem:[#allocation5 + $0x8] sm:$0xff] %vm143_vm1, %v242_v25  ;;  %v238_v28 = vadd.f32 %v339_v27, %v325_v22  ;;  %v232_v29 = vpop.f32.mrb[3].mxu0 }
  0xf7   :  { %245 = vst.msk [vmem:[#allocation5] sm:$0xff] %vm143_vm1, %v241_v26  ;;  %v233_v30 = vadd.f32 %v232_v29, %v134_v24 }
  0xf8   :  { %v244_v31 = vadd.f32 %v238_v28, %v34_v16 }
  0xf9   :  { %v243_v32 = vadd.f32 %v233_v30, %v33_v15  ;;  %257 = vrot.lane.b32.xlu1 %v233_v30, %s412_s1  ;;  %255 = vrot.lane.b32.xlu0 %v228_v20, %s412_s1 }
  0xfa   :  { %248 = vst.msk [vmem:[#allocation5 + $0x18] sm:$0xff] %vm143_vm1, %v244_v31 }
  0xfb   :  { %247 = vst.msk [vmem:[#allocation5 + $0x10] sm:$0xff] %vm143_vm1, %v243_v32 }
  0xfc   :  { %394 = shalt.err (!%p391_p12)
}
  0xfd   :  { %s395_s28 = scalar_lea.hbm %s538_s3, 512 }
  0xfe   :  { %p396_p13 = scmp.ne.s32.totalorder %s538_s3, %s395_s28  ;;  %p399_p0 = scmp.lt.u32.totalorder %s395_s28, %s538_s3 }
 0x100   :  { %p401_p1 = pnand %p399_p0, %p396_p13 }
 0x102   :  { %404 = shalt.err (!%p401_p1)
}
 0x103   :  { %284 = dma.vmem_to_hbm [thread:$0]  %s279_s22, 512, %s538_s3, [#allocation4], %s410_s25, %s410_s25, %s411_s26  }
 0x104   :  { %259 = vrot.lane.b32.xlu1 %v238_v28, %s412_s1 }
 0x167   :  { %v254_v33 = vpop.permute.xlu0 %253 }
 0x168   :  { %v265_v34 = vadd.f32 %v254_v33, %v475_v9 }
 0x16a   :  { %269 = vst.msk [vmem:[%s539_s4] sm:$0xff] %vm45_vm0, %v265_v34 }
 0x16b   :  { %v258_v35 = vpop.permute.xlu1 %257  ;;  %v256_v36 = vpop.permute.xlu0 %255 }
 0x16c   :  { %v267_v37 = vadd.f32 %v258_v35, %v37_v12  ;;  %v266_v38 = vadd.f32 %v256_v36, %v36_v11 }
 0x16e   :  { %271 = vst.msk [vmem:[%s539_s4 + $0x10] sm:$0xff] %vm45_vm0, %v267_v37  ;;  %270 = vst.msk [vmem:[%s539_s4 + $0x8] sm:$0xff] %vm45_vm0, %v266_v38 }
 0x176   :  { %v260_v39 = vpop.permute.xlu1 %259 }
 0x177   :  { %v268_v40 = vadd.f32 %v260_v39, %v38_v14 }
 0x179   :  { %272 = vst.msk [vmem:[%s539_s4 + $0x18] sm:$0xff] %vm45_vm0, %v268_v40 }
 0x17a   :  { %407 = dma.done.wait [#allocation4], 512  }
 0x17b   :  { %408 = vsyncadd [#allocation4], 4294966784 }
 0x17c   :  { %292 = vsyncpa [#allocation3], 1 }
 0x17d   :  { %293 = vsyncpa [#allocation4], 1 }

</bundles_post_ra>
